<compile_context>
chip_gen: v7x
topology: tpu7x:2x2x1
jax: 0.10.0
libtpu: 0.0.40
codegen_flags: <defaults>
</compile_context>

<pallas_src>
import functools

import jax
import jax.numpy as jnp
from jax import lax
from jax.experimental import pallas as pl
from jax.experimental.pallas import tpu as pltpu


# ---------------------------------------------------------------------------
# Single-pair kernel (exactly the nn.Module forward)
# ---------------------------------------------------------------------------
def _contrastive_pair_kernel(margin, x_ref, t_ref, out_ref):
    # x_ref : (2, D)   f32  in VMEM
    # t_ref : (2*T,)   i32  in SMEM (flattened: row0 = target[0], row1 = target[1])
    # out_ref: (1, 1)  f32  in VMEM
    diff = x_ref[0:1, :] - x_ref[1:2, :] + jnp.float32(1e-6)          # (1, D)  VPU
    dist = jnp.sqrt(jnp.sum(diff * diff, axis=1, keepdims=True))      # (1, 1)  XLU reduce

    # torch.equal(target[0], target[1]) on the scalar unit: count mismatches.
    T = t_ref.shape[0] // 2

    def body(i, n_mismatch):
        return n_mismatch + (t_ref[i] != t_ref[T + i]).astype(jnp.int32)

    mismatches = lax.fori_loop(0, T, body, jnp.int32(0), unroll=True)   # scalar i32
    y = jnp.where(mismatches == 0, jnp.float32(1.0), jnp.float32(0.0))  # scalar f32

    hinge = jnp.maximum(jnp.float32(0.0), jnp.float32(margin) - dist)   # (1, 1)
    out_ref[...] = (1.0 - y) * 0.5 * dist + y * 0.5 * hinge


@functools.partial(jax.jit, static_argnames=("margin",))
def contrastive_loss(inp, target, margin=1.25):
    """inp: (2, D) float32, target: (2, T) int32 -> (1,) float32 loss."""
    t_flat = target.reshape(-1)  # contiguous reshape: free under jit
    kernel = functools.partial(_contrastive_pair_kernel, float(margin))
    out = pl.pallas_call(
        kernel,
        out_shape=jax.ShapeDtypeStruct((1, 1), jnp.float32),
        # No grid: single invocation, whole arrays copied once, no pipeline machinery.
        in_specs=[
            pl.BlockSpec(memory_space=pltpu.MemorySpace.VMEM),   # features
            pl.BlockSpec(memory_space=pltpu.MemorySpace.SMEM),   # targets (scalar path)
        ],
        out_specs=pl.BlockSpec(memory_space=pltpu.MemorySpace.VMEM),
    )(inp, t_flat)
    return out.reshape(1)   # matches torch.pairwise_distance output shape (1,)


# ---------------------------------------------------------------------------
# Batched variant: amortizes launch/DMA overhead over B pairs (biggest lever).
# ---------------------------------------------------------------------------
def _contrastive_batched_kernel(margin, x1_ref, x2_ref, y_ref, out_ref):
    # x1_ref, x2_ref: (bp, D) f32 VMEM; y_ref, out_ref: (bp, 1) f32 VMEM
    diff = x1_ref[...] - x2_ref[...] + jnp.float32(1e-6)               # (bp, D)
    dist = jnp.sqrt(jnp.sum(diff * diff, axis=1, keepdims=True))       # (bp, 1)
    y = y_ref[...]                                                     # (bp, 1)
    hinge = jnp.maximum(jnp.float32(0.0), jnp.float32(margin) - dist)
    out_ref[...] = (1.0 - y) * 0.5 * dist + y * 0.5 * hinge


@functools.partial(jax.jit, static_argnames=("margin", "block_pairs"))
def contrastive_loss_batched(inp, target, margin=1.25, block_pairs=512):
    """inp: (B, 2, D) float32, target: (B, 2, T) int32 -> (B,) float32 losses.

    B should be a multiple of 8 (or <= block_pairs) to satisfy TPU tiling.
    """
    B, _, D = inp.shape
    x1 = inp[:, 0, :]
    x2 = inp[:, 1, :]
    # Per-pair torch.equal computed once in the same jit (tiny XLA fusion) so the kernel
    # never DMAs the padded int32 targets into VMEM.
    y = jnp.all(target[:, 0, :] == target[:, 1, :], axis=-1).astype(jnp.float32)[:, None]

    bp = min(block_pairs, B)   # bp == B (full dim) or a multiple of 8: tiling-legal
    kernel = functools.partial(_contrastive_batched_kernel, float(margin))
    out = pl.pallas_call(
        kernel,
        out_shape=jax.ShapeDtypeStruct((B, 1), jnp.float32),
        grid=(pl.cdiv(B, bp),),
        in_specs=[
            pl.BlockSpec((bp, D), lambda i: (i, 0)),
            pl.BlockSpec((bp, D), lambda i: (i, 0)),
            pl.BlockSpec((bp, 1), lambda i: (i, 0)),
        ],
        out_specs=pl.BlockSpec((bp, 1), lambda i: (i, 0)),
        compiler_params=pltpu.CompilerParams(
            dimension_semantics=("parallel",)),   # lets v7x split the batch over 2 TCs
    )(x1, x2, y)
    return out.reshape(B)


# ---------------------------------------------------------------------------
# Plain-JAX references
# ---------------------------------------------------------------------------
def _reference_pair(inp, target, margin=1.25):
    diff = inp[0] - inp[1] + 1e-6
    dist = jnp.sqrt(jnp.sum(diff * diff))
    y = jnp.all(target[0] == target[1]).astype(jnp.float32)
    return ((1.0 - y) * 0.5 * dist + y * 0.5 * jnp.maximum(0.0, margin - dist)).reshape(1)


def _reference_batched(inp, target, margin=1.25):
    diff = inp[:, 0, :] - inp[:, 1, :] + 1e-6
    dist = jnp.sqrt(jnp.sum(diff * diff, axis=-1))
    y = jnp.all(target[:, 0, :] == target[:, 1, :], axis=-1).astype(jnp.float32)
    return (1.0 - y) * 0.5 * dist + y * 0.5 * jnp.maximum(0.0, margin - dist)


if __name__ == "__main__":
    key = jax.random.PRNGKey(0)
    k1, k2, k3, k4 = jax.random.split(key, 4)

    D, T = 128, 8
    x = jax.random.normal(k1, (2, D), dtype=jnp.float32) * 0.1

    # --- single pair: equal targets (y = 1, hinge branch) ---
    t_row = jax.random.randint(k2, (1, T), 0, 5, dtype=jnp.int32)
    t_equal = jnp.tile(t_row, (2, 1))
    out_eq = contrastive_loss(x, t_equal, margin=1.25)
    jax.block_until_ready(out_eq)

    # --- single pair: unequal targets (y = 0, distance branch) ---
    t_neq = jnp.concatenate([t_row, t_row + 1], axis=0)
    out_neq = contrastive_loss(x, t_neq, margin=1.25)
    jax.block_until_ready(out_neq)

    assert jnp.allclose(out_eq, _reference_pair(x, t_equal, 1.25), atol=1e-5)
    assert jnp.allclose(out_neq, _reference_pair(x, t_neq, 1.25), atol=1e-5)

    # --- batched: B pairs per launch, half equal / half unequal targets ---
    B = 64
    xb = jax.random.normal(k3, (B, 2, D), dtype=jnp.float32) * 0.1
    tb0 = jax.random.randint(k4, (B, 1, T), 0, 5, dtype=jnp.int32)
    flip = (jnp.arange(B) % 2).astype(jnp.int32).reshape(B, 1, 1)   # odd pairs mismatch
    tb = jnp.concatenate([tb0, tb0 + flip], axis=1)                 # (B, 2, T)
    out_b = contrastive_loss_batched(xb, tb, margin=1.25)
    jax.block_until_ready(out_b)
    assert jnp.allclose(out_b, _reference_batched(xb, tb, 1.25), atol=1e-5)

    print("KERNEL_OK")
</pallas_src>

<mosaic_0001>
module attributes {stable_mosaic.version = 11 : i64} {
  func.func @_contrastive_pair_kernel(%arg0: memref<2x128xf32, #tpu.memory_space<vmem>>, %arg1: memref<16xi32, #tpu.memory_space<smem>>, %arg2: memref<1x1xf32, #tpu.memory_space<vmem>>) attributes {dimension_semantics = [], scalar_prefetch = 0 : i64, scratch_operands = 0 : i64, tpu.core_type = #tpu.core_type<tc>} {
    %c0 = arith.constant 0 : index
    %c0_0 = arith.constant 0 : index
    %0 = vector.load %arg0[%c0, %c0_0] : memref<2x128xf32, #tpu.memory_space<vmem>>, vector<1x128xf32>
    %c1 = arith.constant 1 : index
    %c0_1 = arith.constant 0 : index
    %1 = vector.load %arg0[%c1, %c0_1] : memref<2x128xf32, #tpu.memory_space<vmem>>, vector<1x128xf32>
    %2 = arith.subf %0, %1 : vector<1x128xf32>
    %cst = arith.constant 9.99999997E-7 : f32
    %3 = vector.broadcast %cst : f32 to vector<1x128xf32>
    %4 = arith.addf %2, %3 : vector<1x128xf32>
    %5 = arith.mulf %4, %4 : vector<1x128xf32>
    %cst_2 = arith.constant dense<0.000000e+00> : vector<1xf32>
    %6 = vector.multi_reduction <add>, %5, %cst_2 [1] : vector<1x128xf32> to vector<1xf32>
    %7 = vector.shape_cast %6 : vector<1xf32> to vector<1x1xf32>
    %8 = math.sqrt %7 : vector<1x1xf32>
    %c0_i32 = arith.constant 0 : i32
    %c0_i32_3 = arith.constant 0 : i32
    %9 = arith.index_cast %c0_i32_3 : i32 to index
    %10 = memref.load %arg1[%9] : memref<16xi32, #tpu.memory_space<smem>>
    %c8_i32 = arith.constant 8 : i32
    %11 = arith.addi %c8_i32, %c0_i32_3 : i32
    %12 = arith.index_cast %11 : i32 to index
    %13 = memref.load %arg1[%12] : memref<16xi32, #tpu.memory_space<smem>>
    %14 = arith.cmpi ne, %10, %13 : i32
    %15 = arith.extui %14 : i1 to i32
    %16 = arith.addi %c0_i32, %15 : i32
    %c1_i32 = arith.constant 1 : i32
    %17 = arith.index_cast %c1_i32 : i32 to index
    %18 = memref.load %arg1[%17] : memref<16xi32, #tpu.memory_space<smem>>
    %c8_i32_4 = arith.constant 8 : i32
    %19 = arith.addi %c8_i32_4, %c1_i32 : i32
    %20 = arith.index_cast %19 : i32 to index
    %21 = memref.load %arg1[%20] : memref<16xi32, #tpu.memory_space<smem>>
    %22 = arith.cmpi ne, %18, %21 : i32
    %23 = arith.extui %22 : i1 to i32
    %24 = arith.addi %16, %23 : i32
    %c2_i32 = arith.constant 2 : i32
    %25 = arith.index_cast %c2_i32 : i32 to index
    %26 = memref.load %arg1[%25] : memref<16xi32, #tpu.memory_space<smem>>
    %c8_i32_5 = arith.constant 8 : i32
    %27 = arith.addi %c8_i32_5, %c2_i32 : i32
    %28 = arith.index_cast %27 : i32 to index
    %29 = memref.load %arg1[%28] : memref<16xi32, #tpu.memory_space<smem>>
    %30 = arith.cmpi ne, %26, %29 : i32
    %31 = arith.extui %30 : i1 to i32
    %32 = arith.addi %24, %31 : i32
    %c3_i32 = arith.constant 3 : i32
    %33 = arith.index_cast %c3_i32 : i32 to index
    %34 = memref.load %arg1[%33] : memref<16xi32, #tpu.memory_space<smem>>
    %c8_i32_6 = arith.constant 8 : i32
    %35 = arith.addi %c8_i32_6, %c3_i32 : i32
    %36 = arith.index_cast %35 : i32 to index
    %37 = memref.load %arg1[%36] : memref<16xi32, #tpu.memory_space<smem>>
    %38 = arith.cmpi ne, %34, %37 : i32
    %39 = arith.extui %38 : i1 to i32
    %40 = arith.addi %32, %39 : i32
    %c4_i32 = arith.constant 4 : i32
    %41 = arith.index_cast %c4_i32 : i32 to index
    %42 = memref.load %arg1[%41] : memref<16xi32, #tpu.memory_space<smem>>
    %c8_i32_7 = arith.constant 8 : i32
    %43 = arith.addi %c8_i32_7, %c4_i32 : i32
    %44 = arith.index_cast %43 : i32 to index
    %45 = memref.load %arg1[%44] : memref<16xi32, #tpu.memory_space<smem>>
    %46 = arith.cmpi ne, %42, %45 : i32
    %47 = arith.extui %46 : i1 to i32
    %48 = arith.addi %40, %47 : i32
    %c5_i32 = arith.constant 5 : i32
    %49 = arith.index_cast %c5_i32 : i32 to index
    %50 = memref.load %arg1[%49] : memref<16xi32, #tpu.memory_space<smem>>
    %c8_i32_8 = arith.constant 8 : i32
    %51 = arith.addi %c8_i32_8, %c5_i32 : i32
    %52 = arith.index_cast %51 : i32 to index
    %53 = memref.load %arg1[%52] : memref<16xi32, #tpu.memory_space<smem>>
    %54 = arith.cmpi ne, %50, %53 : i32
    %55 = arith.extui %54 : i1 to i32
    %56 = arith.addi %48, %55 : i32
    %c6_i32 = arith.constant 6 : i32
    %57 = arith.index_cast %c6_i32 : i32 to index
    %58 = memref.load %arg1[%57] : memref<16xi32, #tpu.memory_space<smem>>
    %c8_i32_9 = arith.constant 8 : i32
    %59 = arith.addi %c8_i32_9, %c6_i32 : i32
    %60 = arith.index_cast %59 : i32 to index
    %61 = memref.load %arg1[%60] : memref<16xi32, #tpu.memory_space<smem>>
    %62 = arith.cmpi ne, %58, %61 : i32
    %63 = arith.extui %62 : i1 to i32
    %64 = arith.addi %56, %63 : i32
    %c7_i32 = arith.constant 7 : i32
    %65 = arith.index_cast %c7_i32 : i32 to index
    %66 = memref.load %arg1[%65] : memref<16xi32, #tpu.memory_space<smem>>
    %c8_i32_10 = arith.constant 8 : i32
    %67 = arith.addi %c8_i32_10, %c7_i32 : i32
    %68 = arith.index_cast %67 : i32 to index
    %69 = memref.load %arg1[%68] : memref<16xi32, #tpu.memory_space<smem>>
    %70 = arith.cmpi ne, %66, %69 : i32
    %71 = arith.extui %70 : i1 to i32
    %72 = arith.addi %64, %71 : i32
    %c8_i32_11 = arith.constant 8 : i32
    %c0_i32_12 = arith.constant 0 : i32
    %73 = arith.cmpi eq, %72, %c0_i32_12 : i32
    %cst_13 = arith.constant 1.000000e+00 : f32
    %cst_14 = arith.constant 0.000000e+00 : f32
    %74 = arith.select %73, %cst_13, %cst_14 : f32
    %cst_15 = arith.constant 1.250000e+00 : f32
    %75 = vector.broadcast %cst_15 : f32 to vector<1x1xf32>
    %76 = arith.subf %75, %8 : vector<1x1xf32>
    %cst_16 = arith.constant 0.000000e+00 : f32
    %77 = vector.broadcast %cst_16 : f32 to vector<1x1xf32>
    %78 = arith.maximumf %77, %76 : vector<1x1xf32>
    %cst_17 = arith.constant 1.000000e+00 : f32
    %79 = arith.subf %cst_17, %74 : f32
    %cst_18 = arith.constant 5.000000e-01 : f32
    %80 = arith.mulf %79, %cst_18 : f32
    %81 = vector.broadcast %80 : f32 to vector<1x1xf32>
    %82 = arith.mulf %81, %8 : vector<1x1xf32>
    %cst_19 = arith.constant 5.000000e-01 : f32
    %83 = arith.mulf %74, %cst_19 : f32
    %84 = vector.broadcast %83 : f32 to vector<1x1xf32>
    %85 = arith.mulf %84, %78 : vector<1x1xf32>
    %86 = arith.addf %82, %85 : vector<1x1xf32>
    %c0_20 = arith.constant 0 : index
    %c0_21 = arith.constant 0 : index
    %87 = vector.load %arg2[%c0_20, %c0_21] : memref<1x1xf32, #tpu.memory_space<vmem>>, vector<1x1xf32>
    tpu.vector_store %arg2[%c0_20, %c0_21], %86 {strides = array<i32>} : memref<1x1xf32, #tpu.memory_space<vmem>>, vector<1x1xf32>,
    return
  }
}

</mosaic_0001>

<bundles_post_ra>
// kernel: contrastive_loss.1
= control target key start
LH: loop header
LB: loop body
LE: loop exit
PB: predicated region body
PF: predicated region fallthrough
CT: control target
= control target key end

     0   :  { %7 = vsyncpa [#allocation4], 0  ;;  %s204_s0 = inlined_call_operand.vmem [shape: f32[2,128], index: 0, kind: input, shape index: {}]   ;;  %s205_s1 = inlined_call_operand.vmem [shape: s32[16], index: 1, kind: input, shape index: {}]   ;;  %s206_s2 = inlined_call_operand.hbm [shape: f32[1,1], index: 2, kind: output, shape index: {}]  }
   0x1   :  { %8 = vsyncpa [#allocation3], 0  ;;  %s17_s11 = sshll.u32 %s205_s1, 4  ;;  %s18_s11 = int_to_ptr.vmem [resolvable:$true] %s17_s11 }
   0x2   :  { %s128_s12 = scalar_lea.vmem %s18_s11, 16  ;;  %p133_p1 = scmp.lt.s32.totalorder %s18_s11, %s18_s11 }
   0x3   :  { %p129_p0 = scmp.ne.s32.totalorder %s18_s11, %s128_s12  ;;  %p134_p2 = scmp.lt.s32.totalorder %s128_s12, %s128_s12 }
   0x5   :  { %p135_p3 = por %p134_p2, %p133_p1 }
   0x7   :  { %p136_p4 = pnand %p135_p3, %p129_p0 }
   0x9   :  { %139 = shalt.err (!%p136_p4)
}
   0xa   :  { %s166_s13 = smov [#allocation2]  }
   0xb   :  { %20 = dma.vmem_to_smem %s18_s11, 16, %s166_s13, [#allocation4]  }
   0xc   :  { %162 = dma.done.wait [#allocation4], 16  }
   0xd   :  { %163 = vsyncadd [#allocation4], 4294967280 }
   0xe   :  { %24 = sfence }
   0xf   :  { %v25_v0 = vld [vmem:[%s204_s0] sm:$0x1]  ;;  %v26_v1 = vld [vmem:[%s204_s0 + $0x1] sm:$0x1]  ;;  %vm30_vm0 = vcmask 1040384   ;;  %s41_s1 = sld [smem:[#allocation2]] }
  0x10   :  { %v27_v2 = vsub.f32 %v25_v0, %v26_v1  ;;  %s109_s18 = sld [smem:[#allocation2 + $0x8]]  ;;  %s110_s19 = sld [smem:[#allocation2 + $0x1]]  ;;  %vm92_vm3 = vcmask 0  }
  0x11   :  { %s111_s20 = sld [smem:[#allocation2 + $0x9]]  ;;  %s112_s21 = sld [smem:[#allocation2 + $0x2]] }
  0x12   :  { %v28_v3 = vadd.f32 1e-06, %v27_v2  ;;  %s113_s22 = sld [smem:[#allocation2 + $0xa]]  ;;  %s114_s23 = sld [smem:[#allocation2 + $0x3]] }
  0x13   :  { %s115_s24 = sld [smem:[#allocation2 + $0xb]]  ;;  %s116_s25 = sld [smem:[#allocation2 + $0x4]] }
  0x14   :  { %v29_v4 = vmul.f32 %v28_v3, %v28_v3  ;;  %s117_s26 = sld [smem:[#allocation2 + $0xc]]  ;;  %s118_s27 = sld [smem:[#allocation2 + $0x5]] }
  0x15   :  { %s119_s28 = sld [smem:[#allocation2 + $0xd]]  ;;  %s120_s30 = sld [smem:[#allocation2 + $0x6]] }
  0x16   :  { %v31_v5 = vsel %vm30_vm0, %v29_v4, 0.0  ;;  %p43_p5 = scmp.ne.s32.totalorder %s41_s1, %s109_s18  ;;  %s121_s3 = sld [smem:[#allocation2 + $0xe]] }
  0x17   :  { %32 = vadd.xlane.f32.xlu0 %v31_v5  ;;  %p47_p6 = scmp.ne.s32.totalorder %s110_s19, %s111_s20  ;;  %s122_s7 = sld [smem:[#allocation2 + $0x7]] }
  0x18   :  { %s44_s0 = scalar_select %p43_p5, 1, 0 }
  0x19   :  { %p52_p7 = scmp.ne.s32.totalorder %s112_s21, %s113_s22  ;;  %p57_p8 = scmp.ne.s32.totalorder %s114_s23, %s115_s24 }
  0x1a   :  { %s48_s29 = scalar_select %p47_p6, 1, 0 }
  0x1b   :  { %s53_s4 = scalar_select %p52_p7, 1, 0 }
  0x1c   :  { %s49_s5 = sadd.s32 %s48_s29, %s44_s0  ;;  %p62_p9 = scmp.ne.s32.totalorder %s116_s25, %s117_s26 }
  0x1d   :  { %s58_s6 = scalar_select %p57_p8, 1, 0 }
  0x1e   :  { %s123_s8 = sld [smem:[#allocation2 + $0xf]]  ;;  %s54_s9 = sadd.s32 %s53_s4, %s49_s5 }
  0x1f   :  { %p67_p10 = scmp.ne.s32.totalorder %s118_s27, %s119_s28  ;;  %s59_s11 = sadd.s32 %s58_s6, %s54_s9 }
  0x20   :  { %s63_s10 = scalar_select %p62_p9, 1, 0 }
  0x21   :  { %p72_p11 = scmp.ne.s32.totalorder %s120_s30, %s121_s3  ;;  %s167_s22 = smov [#allocation5]  }
  0x22   :  { %s68_s12 = scalar_select %p67_p10, 1, 0 }
  0x23   :  { %s64_s13 = sadd.s32 %s63_s10, %s59_s11  ;;  %s100_s23 = sshll.u32 %s167_s22, 4  ;;  %s101_s23 = int_to_ptr.vmem [resolvable:$true] %s100_s23 }
  0x24   :  { %p77_p12 = scmp.ne.s32.totalorder %s122_s7, %s123_s8  ;;  %s69_s15 = sadd.s32 %s68_s12, %s64_s13 }
  0x25   :  { %s73_s14 = scalar_select %p72_p11, 1, 0 }
  0x26   :  { %s78_s16 = scalar_select %p77_p12, 1, 0 }
  0x27   :  { %s74_s17 = sadd.s32 %s73_s14, %s69_s15  ;;  %s140_s24 = scalar_lea.vmem %s101_s23, 16 }
  0x28   :  { %s79_s1 = sadd.s32 %s78_s16, %s74_s17  ;;  %p141_p0 = scmp.ne.s32.totalorder %s101_s23, %s140_s24 }
  0x29   :  { %p80_p13 = scmp.eq.s32.totalorder %s79_s1, 0  ;;  %s144_s25 = scalar_lea.vmem %s101_s23, 32 }
  0x2a   :  { %p145_p1 = scmp.lt.s32.totalorder %s101_s23, %s101_s23  ;;  %p146_p2 = scmp.lt.s32.totalorder %s144_s25, %s140_s24 }
  0x2b   :  { %s81_s18 = scalar_select %p80_p13, 1.0, 0.0 }
  0x2c   :  { %p147_p3 = por %p146_p2, %p145_p1 }
  0x2d   :  { %s84_s19 = ssub.f32 1.0, %s81_s18  ;;  %s88_s20 = smul.f32 0.5, %s81_s18 }
  0x2e   :  { %p148_p4 = pnand %p147_p3, %p141_p0 }
  0x2f   :  { %s85_s21 = smul.f32 0.5, %s84_s19  ;;  %v89_v14 = vstv %s88_s20 }
  0x31   :  { %v86_v13 = vstv %s85_s21 }
  0xa4   :  { %v33_v6 = vpop.xlane.xlu0 %32 }
  0xa5   :  { %126 = vrsqrt.f32 %v33_v6  ;;  %vm36_vm1 = vcmp.eq.f32.partialorder %v33_v6, inf  ;;  %v39_v9 = vand.u32 2147483648, %v33_v6  ;;  %vm38_vm2 = vcmp.eq.f32.partialorder %v33_v6, 0.0 }
  0xaf   :  { %v127_v7 = vpop.eup %126 }
  0xb0   :  { %v35_v8 = vmul.f32 %v127_v7, %v33_v6 }
  0xb2   :  { %v37_v10 = vsel %vm36_vm1, %v33_v6, %v35_v8 }
  0xb3   :  { %v40_v11 = vsel %vm38_vm2, %v39_v9, %v37_v10 }
  0xb4   :  { %v82_v12 = vsub.f32 1.25, %v40_v11  ;;  %v87_v16 = vmul.f32 %v86_v13, %v40_v11 }
  0xb6   :  { %v83_v15 = vmax.f32 %v82_v12, 0.0 }
  0xb8   :  { %v90_v17 = vmul.f32 %v89_v14, %v83_v15 }
  0xba   :  { %v91_v18 = vadd.f32 %v90_v17, %v87_v16 }
  0xbc   :  { %93 = vst.msk [vmem:[#allocation5] sm:$0x1] %vm92_vm3, %v91_v18 }
  0xbd   :  { %151 = shalt.err (!%p148_p4)
}
  0xbe   :  { %s152_s0 = scalar_lea.hbm %s206_s2, 16 }
  0xbf   :  { %p153_p5 = scmp.ne.s32.totalorder %s206_s2, %s152_s0  ;;  %p156_p6 = scmp.lt.u32.totalorder %s152_s0, %s206_s2 }
  0xc1   :  { %p158_p7 = pnand %p156_p6, %p153_p5 }
  0xc3   :  { %161 = shalt.err (!%p158_p7)
}
  0xc4   :  { %103 = dma.vmem_to_hbm [thread:$0]  %s101_s23, 16, %s206_s2, [#allocation3]  }
  0xc5   :  { %164 = dma.done.wait [#allocation3], 16  }
  0xc6   :  { %165 = vsyncadd [#allocation3], 4294967280 }
  0xc7   :  { %107 = vsyncpa [#allocation3], 1 }
  0xc8   :  { %108 = vsyncpa [#allocation4], 1 }

</bundles_post_ra>
